<compile_context>
chip_gen: v5e
topology: v5e:2x2
jax: 0.10.0
libtpu: 0.0.40
codegen_flags: <defaults>
</compile_context>

<pallas_src>
import jax
import jax.numpy as jnp
from jax import lax
from jax.experimental import pallas as pl
from jax.experimental.pallas import tpu as pltpu


# ----------------------------- Pallas kernel ------------------------------

def _ae_kernel(x_ref, w1_ref, wmid_ref, w6_ref, b15_ref, b6_ref, out_ref):
    # x_ref:    (tok_block, L)  -- native token-major input tile
    # w1_ref:   (H, L)          -- encoder.0 weight (PyTorch (out, in) layout)
    # wmid_ref: (4, H, H)       -- w2..w5 stacked
    # w6_ref:   (L, H)          -- decoder.4 weight
    # b15_ref:  (5, H, 1)       -- b1..b5 stacked (lane-broadcast in kernel)
    # b6_ref:   (L, 1)
    # out_ref:  (L, tok_block)  -- already in the permuted (B, L, N) layout
    x = x_ref[...]

    # Layer 1: contract on L of both operands -> (H, tok_block), feature-major.
    h = lax.dot_general(
        w1_ref[...], x,
        dimension_numbers=(((1,), (1,)), ((), ())),
        preferred_element_type=jnp.float32)
    h = jnp.maximum(h + b15_ref[0], 0.0)

    # Layers 2..5:  (H, H) @ (H, tok_block) + bias, ReLU.
    for i in range(4):
        h = jnp.dot(wmid_ref[i], h, preferred_element_type=jnp.float32)
        h = jnp.maximum(h + b15_ref[i + 1], 0.0)

    # Layer 6 (no ReLU):  (L, H) @ (H, tok_block) + bias.
    out = jnp.dot(w6_ref[...], h, preferred_element_type=jnp.float32)
    out = out + b6_ref[...]

    out_ref[...] = out.astype(out_ref.dtype)


# ------------------------------- wrapper -----------------------------------

def ae_forward_pallas(params, x):
    """AE.forward:  decoder(encoder(x)).permute(0, 2, 1).

    x: (B, N, L) float32 with L = win_size.  Returns (B, L, N).
    """
    B, N, L = x.shape
    H = L // 2

    LANE = 128
    N_pad = ((N + LANE - 1) // LANE) * LANE
    if N_pad != N:
        # Pad token axis so stores stay unmasked; sliced off after the call.
        x = jnp.pad(x, ((0, 0), (0, N_pad - N), (0, 0)))

    # Largest lane tile (multiple of 128) that divides N_pad, capped at 2048.
    MAX_TILE = 2048
    if N_pad <= MAX_TILE:
        tok_block = N_pad
    else:
        tok_block = max(t for t in range(LANE, MAX_TILE + 1, LANE)
                        if N_pad % t == 0)
    num_tok_tiles = N_pad // tok_block

    # Pack operands (tiny arrays; free under jit).
    wmid = jnp.stack([params['w2'], params['w3'], params['w4'], params['w5']])
    b15 = jnp.stack([params['b1'], params['b2'], params['b3'],
                     params['b4'], params['b5']])[..., None]      # (5, H, 1)
    b6 = params['b6'][:, None]                                     # (L, 1)

    out = pl.pallas_call(
        _ae_kernel,
        out_shape=jax.ShapeDtypeStruct((B, L, N_pad), x.dtype),
        grid=(B, num_tok_tiles),
        in_specs=[
            pl.BlockSpec((None, tok_block, L), lambda b, n: (b, n, 0)),   # x
            pl.BlockSpec((H, L), lambda b, n: (0, 0)),                    # w1
            pl.BlockSpec((4, H, H), lambda b, n: (0, 0, 0)),              # w2..w5
            pl.BlockSpec((L, H), lambda b, n: (0, 0)),                    # w6
            pl.BlockSpec((5, H, 1), lambda b, n: (0, 0, 0)),              # b1..b5
            pl.BlockSpec((L, 1), lambda b, n: (0, 0)),                    # b6
        ],
        out_specs=pl.BlockSpec((None, L, tok_block), lambda b, n: (b, 0, n)),
        compiler_params=pltpu.CompilerParams(
            dimension_semantics=("parallel", "parallel")),
    )(x, params['w1'], wmid, params['w6'], b15, b6)

    if N_pad != N:
        out = out[:, :, :N]
    return out


# ------------------------------ reference ----------------------------------

def ae_reference(params, x):
    h = x
    h = jax.nn.relu(h @ params['w1'].T + params['b1'])
    h = jax.nn.relu(h @ params['w2'].T + params['b2'])
    h = jax.nn.relu(h @ params['w3'].T + params['b3'])
    h = jax.nn.relu(h @ params['w4'].T + params['b4'])
    h = jax.nn.relu(h @ params['w5'].T + params['b5'])
    h = h @ params['w6'].T + params['b6']
    return jnp.transpose(h, (0, 2, 1))


# --------------------------------- main -------------------------------------

if __name__ == "__main__":
    win_size = 16                 # config.win_size (seq_len)
    L = win_size
    H = L // 2
    B, N = 2, 128                 # batch, tokens/rows per batch element

    key = jax.random.PRNGKey(0)
    keys = jax.random.split(key, 13)

    def linear_init(kw, kb, out_dim, in_dim):
        bound = 1.0 / (in_dim ** 0.5)   # PyTorch default Linear init range
        w = jax.random.uniform(kw, (out_dim, in_dim), jnp.float32, -bound, bound)
        b = jax.random.uniform(kb, (out_dim,), jnp.float32, -bound, bound)
        return w, b

    params = {}
    params['w1'], params['b1'] = linear_init(keys[0], keys[1], H, L)
    params['w2'], params['b2'] = linear_init(keys[2], keys[3], H, H)
    params['w3'], params['b3'] = linear_init(keys[4], keys[5], H, H)
    params['w4'], params['b4'] = linear_init(keys[6], keys[7], H, H)
    params['w5'], params['b5'] = linear_init(keys[8], keys[9], H, H)
    params['w6'], params['b6'] = linear_init(keys[10], keys[11], L, H)

    x = jax.random.normal(keys[12], (B, N, L), jnp.float32)

    fwd = jax.jit(ae_forward_pallas)
    out = jax.block_until_ready(fwd(params, x))

    ref = ae_reference(params, x)
    assert out.shape == (B, L, N), out.shape
    assert jnp.allclose(out, ref, atol=1e-4, rtol=1e-4), "mismatch vs reference"

    print("KERNEL_OK")
</pallas_src>

<mosaic_0001>
module attributes {stable_mosaic.version = 11 : i64} {
  func.func @_ae_kernel(%arg0: i32, %arg1: i32, %arg2: memref<1x128x16xf32, #tpu.memory_space<vmem>>, %arg3: memref<8x16xf32, #tpu.memory_space<vmem>>, %arg4: memref<4x8x8xf32, #tpu.memory_space<vmem>>, %arg5: memref<16x8xf32, #tpu.memory_space<vmem>>, %arg6: memref<5x8x1xf32, #tpu.memory_space<vmem>>, %arg7: memref<16x1xf32, #tpu.memory_space<vmem>>, %arg8: memref<1x16x128xf32, #tpu.memory_space<vmem>>) attributes {dimension_semantics = [#tpu.dimension_semantics<parallel>, #tpu.dimension_semantics<parallel>], iteration_bounds = array<i64: 2, 1>, scalar_prefetch = 0 : i64, scratch_operands = 0 : i64, tpu.core_type = #tpu.core_type<tc>, window_params = [{transform_indices = @transform_0, window_bounds = array<i64: 1, 128, 16>}, {pipeline_mode = #tpu.pipeline_mode<synchronous>, transform_indices = @transform_1, window_bounds = array<i64: 8, 16>}, {pipeline_mode = #tpu.pipeline_mode<synchronous>, transform_indices = @transform_2, window_bounds = array<i64: 4, 8, 8>}, {pipeline_mode = #tpu.pipeline_mode<synchronous>, transform_indices = @transform_3, window_bounds = array<i64: 16, 8>}, {pipeline_mode = #tpu.pipeline_mode<synchronous>, transform_indices = @transform_4, window_bounds = array<i64: 5, 8, 1>}, {pipeline_mode = #tpu.pipeline_mode<synchronous>, transform_indices = @transform_5, window_bounds = array<i64: 16, 1>}, {transform_indices = @transform_6, window_bounds = array<i64: 1, 16, 128>}]} {
    %c0 = arith.constant 0 : index
    %c0_0 = arith.constant 0 : index
    %c0_1 = arith.constant 0 : index
    %0 = vector.load %arg2[%c0, %c0_0, %c0_1] : memref<1x128x16xf32, #tpu.memory_space<vmem>>, vector<1x128x16xf32>
    %1 = vector.shape_cast %0 : vector<1x128x16xf32> to vector<128x16xf32>
    %c0_2 = arith.constant 0 : index
    %c0_3 = arith.constant 0 : index
    %2 = vector.load %arg3[%c0_2, %c0_3] : memref<8x16xf32, #tpu.memory_space<vmem>>, vector<8x16xf32>
    %cst = arith.constant dense<0.000000e+00> : vector<8x128xf32>
    %3 = tpu.matmul %2, %1, %cst {dimension_numbers = #tpu.dot_dimension_numbers<[1], [1], [0], [0], [0, 0, 1, 0], [], []>} : vector<8x16xf32>, vector<128x16xf32>, vector<8x128xf32> -> vector<8x128xf32>
    %c0_4 = arith.constant 0 : index
    %c0_5 = arith.constant 0 : index
    %c0_6 = arith.constant 0 : index
    %4 = vector.load %arg6[%c0_4, %c0_5, %c0_6] : memref<5x8x1xf32, #tpu.memory_space<vmem>>, vector<1x8x1xf32>
    %5 = vector.shape_cast %4 : vector<1x8x1xf32> to vector<8x1xf32>
    %6 = vector.broadcast %5 : vector<8x1xf32> to vector<8x128xf32>
    %7 = arith.addf %3, %6 : vector<8x128xf32>
    %cst_7 = arith.constant 0.000000e+00 : f32
    %8 = vector.broadcast %cst_7 : f32 to vector<8x128xf32>
    %9 = arith.maximumf %7, %8 : vector<8x128xf32>
    %c0_8 = arith.constant 0 : index
    %c0_9 = arith.constant 0 : index
    %c0_10 = arith.constant 0 : index
    %10 = vector.load %arg4[%c0_8, %c0_9, %c0_10] : memref<4x8x8xf32, #tpu.memory_space<vmem>>, vector<1x8x8xf32>
    %11 = vector.shape_cast %10 : vector<1x8x8xf32> to vector<8x8xf32>
    %cst_11 = arith.constant dense<0.000000e+00> : vector<8x128xf32>
    %12 = tpu.matmul %11, %9, %cst_11 {dimension_numbers = #tpu.dot_dimension_numbers<[1], [0], [0], [1], [0, 0, 1, 1], [], []>} : vector<8x8xf32>, vector<8x128xf32>, vector<8x128xf32> -> vector<8x128xf32>
    %c1 = arith.constant 1 : index
    %c0_12 = arith.constant 0 : index
    %c0_13 = arith.constant 0 : index
    %13 = vector.load %arg6[%c1, %c0_12, %c0_13] : memref<5x8x1xf32, #tpu.memory_space<vmem>>, vector<1x8x1xf32>
    %14 = vector.shape_cast %13 : vector<1x8x1xf32> to vector<8x1xf32>
    %15 = vector.broadcast %14 : vector<8x1xf32> to vector<8x128xf32>
    %16 = arith.addf %12, %15 : vector<8x128xf32>
    %cst_14 = arith.constant 0.000000e+00 : f32
    %17 = vector.broadcast %cst_14 : f32 to vector<8x128xf32>
    %18 = arith.maximumf %16, %17 : vector<8x128xf32>
    %c1_15 = arith.constant 1 : index
    %c0_16 = arith.constant 0 : index
    %c0_17 = arith.constant 0 : index
    %19 = vector.load %arg4[%c1_15, %c0_16, %c0_17] : memref<4x8x8xf32, #tpu.memory_space<vmem>>, vector<1x8x8xf32>
    %20 = vector.shape_cast %19 : vector<1x8x8xf32> to vector<8x8xf32>
    %cst_18 = arith.constant dense<0.000000e+00> : vector<8x128xf32>
    %21 = tpu.matmul %20, %18, %cst_18 {dimension_numbers = #tpu.dot_dimension_numbers<[1], [0], [0], [1], [0, 0, 1, 1], [], []>} : vector<8x8xf32>, vector<8x128xf32>, vector<8x128xf32> -> vector<8x128xf32>
    %c2 = arith.constant 2 : index
    %c0_19 = arith.constant 0 : index
    %c0_20 = arith.constant 0 : index
    %22 = vector.load %arg6[%c2, %c0_19, %c0_20] : memref<5x8x1xf32, #tpu.memory_space<vmem>>, vector<1x8x1xf32>
    %23 = vector.shape_cast %22 : vector<1x8x1xf32> to vector<8x1xf32>
    %24 = vector.broadcast %23 : vector<8x1xf32> to vector<8x128xf32>
    %25 = arith.addf %21, %24 : vector<8x128xf32>
    %cst_21 = arith.constant 0.000000e+00 : f32
    %26 = vector.broadcast %cst_21 : f32 to vector<8x128xf32>
    %27 = arith.maximumf %25, %26 : vector<8x128xf32>
    %c2_22 = arith.constant 2 : index
    %c0_23 = arith.constant 0 : index
    %c0_24 = arith.constant 0 : index
    %28 = vector.load %arg4[%c2_22, %c0_23, %c0_24] : memref<4x8x8xf32, #tpu.memory_space<vmem>>, vector<1x8x8xf32>
    %29 = vector.shape_cast %28 : vector<1x8x8xf32> to vector<8x8xf32>
    %cst_25 = arith.constant dense<0.000000e+00> : vector<8x128xf32>
    %30 = tpu.matmul %29, %27, %cst_25 {dimension_numbers = #tpu.dot_dimension_numbers<[1], [0], [0], [1], [0, 0, 1, 1], [], []>} : vector<8x8xf32>, vector<8x128xf32>, vector<8x128xf32> -> vector<8x128xf32>
    %c3 = arith.constant 3 : index
    %c0_26 = arith.constant 0 : index
    %c0_27 = arith.constant 0 : index
    %31 = vector.load %arg6[%c3, %c0_26, %c0_27] : memref<5x8x1xf32, #tpu.memory_space<vmem>>, vector<1x8x1xf32>
    %32 = vector.shape_cast %31 : vector<1x8x1xf32> to vector<8x1xf32>
    %33 = vector.broadcast %32 : vector<8x1xf32> to vector<8x128xf32>
    %34 = arith.addf %30, %33 : vector<8x128xf32>
    %cst_28 = arith.constant 0.000000e+00 : f32
    %35 = vector.broadcast %cst_28 : f32 to vector<8x128xf32>
    %36 = arith.maximumf %34, %35 : vector<8x128xf32>
    %c3_29 = arith.constant 3 : index
    %c0_30 = arith.constant 0 : index
    %c0_31 = arith.constant 0 : index
    %37 = vector.load %arg4[%c3_29, %c0_30, %c0_31] : memref<4x8x8xf32, #tpu.memory_space<vmem>>, vector<1x8x8xf32>
    %38 = vector.shape_cast %37 : vector<1x8x8xf32> to vector<8x8xf32>
    %cst_32 = arith.constant dense<0.000000e+00> : vector<8x128xf32>
    %39 = tpu.matmul %38, %36, %cst_32 {dimension_numbers = #tpu.dot_dimension_numbers<[1], [0], [0], [1], [0, 0, 1, 1], [], []>} : vector<8x8xf32>, vector<8x128xf32>, vector<8x128xf32> -> vector<8x128xf32>
    %c4 = arith.constant 4 : index
    %c0_33 = arith.constant 0 : index
    %c0_34 = arith.constant 0 : index
    %40 = vector.load %arg6[%c4, %c0_33, %c0_34] : memref<5x8x1xf32, #tpu.memory_space<vmem>>, vector<1x8x1xf32>
    %41 = vector.shape_cast %40 : vector<1x8x1xf32> to vector<8x1xf32>
    %42 = vector.broadcast %41 : vector<8x1xf32> to vector<8x128xf32>
    %43 = arith.addf %39, %42 : vector<8x128xf32>
    %cst_35 = arith.constant 0.000000e+00 : f32
    %44 = vector.broadcast %cst_35 : f32 to vector<8x128xf32>
    %45 = arith.maximumf %43, %44 : vector<8x128xf32>
    %c0_36 = arith.constant 0 : index
    %c0_37 = arith.constant 0 : index
    %46 = vector.load %arg5[%c0_36, %c0_37] : memref<16x8xf32, #tpu.memory_space<vmem>>, vector<16x8xf32>
    %cst_38 = arith.constant dense<0.000000e+00> : vector<16x128xf32>
    %47 = tpu.matmul %46, %45, %cst_38 {dimension_numbers = #tpu.dot_dimension_numbers<[1], [0], [0], [1], [0, 0, 1, 1], [], []>} : vector<16x8xf32>, vector<8x128xf32>, vector<16x128xf32> -> vector<16x128xf32>
    %c0_39 = arith.constant 0 : index
    %c0_40 = arith.constant 0 : index
    %48 = vector.load %arg7[%c0_39, %c0_40] : memref<16x1xf32, #tpu.memory_space<vmem>>, vector<16x1xf32>
    %49 = vector.broadcast %48 : vector<16x1xf32> to vector<16x128xf32>
    %50 = arith.addf %47, %49 : vector<16x128xf32>
    %c0_41 = arith.constant 0 : index
    %c0_42 = arith.constant 0 : index
    %c0_43 = arith.constant 0 : index
    %51 = vector.load %arg8[%c0_41, %c0_42, %c0_43] : memref<1x16x128xf32, #tpu.memory_space<vmem>>, vector<1x16x128xf32>
    %52 = vector.shape_cast %51 : vector<1x16x128xf32> to vector<16x128xf32>
    %53 = vector.shape_cast %50 : vector<16x128xf32> to vector<1x16x128xf32>
    tpu.vector_store %arg8[%c0_41, %c0_42, %c0_43], %53 {strides = array<i32>} : memref<1x16x128xf32, #tpu.memory_space<vmem>>, vector<1x16x128xf32>,
    return
  }
  func.func @transform_0(%arg0: i32, %arg1: i32) -> (i32, i32, i32) {
    %c0_i32 = arith.constant 0 : i32
    %c0_i32_0 = arith.constant 0 : i32
    return %arg0, %arg1, %c0_i32 : i32, i32, i32
  }
  func.func @transform_1(%arg0: i32, %arg1: i32) -> (i32, i32) {
    %c0_i32 = arith.constant 0 : i32
    %c0_i32_0 = arith.constant 0 : i32
    %c0_i32_1 = arith.constant 0 : i32
    return %c0_i32, %c0_i32_0 : i32, i32
  }
  func.func @transform_2(%arg0: i32, %arg1: i32) -> (i32, i32, i32) {
    %c0_i32 = arith.constant 0 : i32
    %c0_i32_0 = arith.constant 0 : i32
    %c0_i32_1 = arith.constant 0 : i32
    %c0_i32_2 = arith.constant 0 : i32
    return %c0_i32, %c0_i32_0, %c0_i32_1 : i32, i32, i32
  }
  func.func @transform_3(%arg0: i32, %arg1: i32) -> (i32, i32) {
    %c0_i32 = arith.constant 0 : i32
    %c0_i32_0 = arith.constant 0 : i32
    %c0_i32_1 = arith.constant 0 : i32
    return %c0_i32, %c0_i32_0 : i32, i32
  }
  func.func @transform_4(%arg0: i32, %arg1: i32) -> (i32, i32, i32) {
    %c0_i32 = arith.constant 0 : i32
    %c0_i32_0 = arith.constant 0 : i32
    %c0_i32_1 = arith.constant 0 : i32
    %c0_i32_2 = arith.constant 0 : i32
    return %c0_i32, %c0_i32_0, %c0_i32_1 : i32, i32, i32
  }
  func.func @transform_5(%arg0: i32, %arg1: i32) -> (i32, i32) {
    %c0_i32 = arith.constant 0 : i32
    %c0_i32_0 = arith.constant 0 : i32
    %c0_i32_1 = arith.constant 0 : i32
    return %c0_i32, %c0_i32_0 : i32, i32
  }
  func.func @transform_6(%arg0: i32, %arg1: i32) -> (i32, i32, i32) {
    %c0_i32 = arith.constant 0 : i32
    %c0_i32_0 = arith.constant 0 : i32
    return %arg0, %c0_i32, %arg1 : i32, i32, i32
  }
}

</mosaic_0001>

<bundles_post_ra>
// kernel: ae_forward_pallas.1
= control target key start
LH: loop header
LB: loop body
LE: loop exit
PB: predicated region body
PF: predicated region fallthrough
CT: control target
= control target key end

     0   :  { %11 = vsyncpa [#allocation3], 0  ;;  %s1052_s0 = inlined_call_operand.vmem [shape: f32[2,128,16], index: 0, kind: input, shape index: {}]   ;;  %s1053_s1 = inlined_call_operand.vmem [shape: f32[8,16], index: 1, kind: input, shape index: {}]   ;;  %s1054_s2 = inlined_call_operand.vmem [shape: f32[4,8,8], index: 2, kind: input, shape index: {}]   ;;  %s1055_s3 = inlined_call_operand.vmem [shape: f32[16,8], index: 3, kind: input, shape index: {}]   ;;  %s1056_s4 = inlined_call_operand.vmem [shape: f32[5,8,1], index: 4, kind: input, shape index: {}]   ;;  %s1057_s5 = inlined_call_operand.vmem [shape: f32[16,1], index: 5, kind: input, shape index: {}]   ;;  %s1058_s6 = inlined_call_operand.hbm [shape: f32[2,16,128], index: 6, kind: output, shape index: {}]  }
   0x1   :  { %13 = vsyncpa [#allocation3 + $0x1], 0  ;;  %s872_s21 = smov 0   ;;  %s874_s22 = smov 0  }
   0x2   :  { %s876_s23 = smov 0   ;;  %s878_s24 = smov 0  }
   0x3   :  { %s880_s25 = smov 0   ;;  %s882_s26 = smov 0  }
   0x4 LB: > { %s648_s27 = sadd.s32 4294967295, %s832_s26   ;;  %s649_s28 = sadd.s32 4294967294, %s832_s26   ;;  %s832_s26 = sphi %s882_s26, %s19_s26   ;;  %s828_s25 = sphi %s880_s25, %s1065_s25   ;;  %s824_s24 = sphi %s878_s24, %s1064_s24   ;;  %s820_s23 = sphi %s876_s23, %s1063_s23   ;;  %s816_s22 = sphi %s874_s22, %s1062_s22   ;;  %s812_s21 = sphi %s872_s21, %s1061_s21  }
   0x5   : > { %s31_s29 = sadd.s32 1, %s828_s25  ;;  %s173_s30 = sadd.s32 1, %s820_s23 }
   0x6   : > { %p33_p0 = scmp.ge.s32.totalorder %s31_s29, 2  ;;  %p183_p1 = scmp.ne.s32.totalorder %s820_s23, %s816_s22 }
   0x7   : > { %p184_p2 = scmp.eq.s32.totalorder %s648_s27, 1  ;;  %p189_p3 = scmp.ne.s32.totalorder %s816_s22, %s812_s21 }
   0x8   : > { %s1067_s29 = smov (%p33_p0, %s31_s29), 0  ;;  %p190_p5 = scmp.eq.s32.totalorder %s649_s28, 1 }
   0x9   : > { %p912_p4 = por %p184_p2, %p183_p1  ;;  %s168_s8 = ssub.s32 %s828_s25, %s1067_s29 }
   0xa   : > { %p652_p6 = scmp.ge.s32.totalorder %s832_s26, 1  ;;  %p171_p7 = scmp.eq.s32.totalorder %s168_s8, 0 }
   0xb   : > { %p919_p8 = por %p190_p5, %p189_p3  ;;  %p236_p9 = scmp.lt.s32.totalorder %s832_s26, 3 }
   0xc   : > { %s925_s10 = scalar_select %p171_p7, %s820_s23, %s173_s30  }
   0xd   : > { %p237_p10 = pnand %p652_p6, %p236_p9 }
   0xe   : > { %p271_p11 = scmp.lt.s32.totalorder (!%p237_p10), %s824_s24, 1  ;;  %s267_s16 = sand.u32 (!%p237_p10), 1, %s816_s22  }
   0xf   : > { %240 = sbr.rel (%p237_p10) target bundleno = 901 (0x385), region = 44  ;;  %s653_s17 = sshll.u32 (!%p237_p10), %s267_s16, 4 }
  0x10   : > { %s692_s18 = sshll.u32 (!%p237_p10), %s824_s24, 4  ;;  %s269_s28 = scalar_lea.vmem (!%p237_p10), [#allocation2], %s653_s17 }
  0x11   : > { %s566_s27 = scalar_lea.hbm (!%p237_p10), %s1058_s6, %s692_s18  ;;  %s567_s30 = sshll.u32 (!%p237_p10), %s269_s28, 4  ;;  %s568_s30 = int_to_ptr.vmem [resolvable:$true] %s567_s30 }
  0x12   : > { %s569_s8 = sshll.u32 (!%p237_p10), %s566_s27, 4  ;;  %s570_s8 = int_to_ptr.hbm [resolvable:$true] %s569_s8 }
  0x14   : > { %s272_s11 = scalar_select %p271_p11, %s824_s24, 1  ;;  %vm303_vm0 = vcmask 130048   ;;  %v297_v7 = vld [vmem:[%s1056_s4] sm:$0xff]  ;;  %v834_v9 = vmov 0   ;;  %v673_v11 = vld [vmem:[%s1056_s4 + $0x8] sm:$0xff]  ;;  %vm384_vm1 = vcmask 64512  }
  0x15   : > { %751 = vset.pattern.permute.xlu0 %v834_v9  ;;  %752 = vset.pattern.permute.xlu1 %v834_v9  ;;  %v511_v14 = vld [vmem:[%s1057_s5 + $0x8] sm:$0xff]  ;;  %v296_v20 = vld [vmem:[%s1053_s1] sm:$0xff]  ;;  %v676_v26 = vld [vmem:[%s1056_s4 + $0x10] sm:$0xff]  ;;  %s768_s24 = sshra.s32 %s570_s8, 4  ;;  %s769_s24 = int_to_ptr.hbm [resolvable:$true] %s768_s24 }
  0x16   : > { %s691_s12 = sshll.u32 %s272_s11, 7  ;;  %300 = vperm.xlu0 %751, %v297_v7   ;;  %753 = vset.pattern.permute.xlu2 %v834_v9  ;;  %v376_v25 = vld [vmem:[%s1054_s2] sm:$0xff]  ;;  %v679_v27 = vld [vmem:[%s1056_s4 + $0x18] sm:$0xff]  ;;  %v675_v32 = vld [vmem:[%s1054_s2 + $0x8] sm:$0xff]  ;;  %s554_s11 = scalar_lea.sflag [#allocation3], %s267_s16 }
  0x17   : > { %s932_s15 = scalar_lea.vmem %s1052_s0, %s691_s12  ;;  %415 = vperm.xlu1 %752, %v676_v26   ;;  %v678_v37 = vld [vmem:[%s1054_s2 + $0x10] sm:$0xff]  ;;  %v682_v38 = vld [vmem:[%s1056_s4 + $0x20] sm:$0xff]  ;;  %v681_v44 = vld [vmem:[%s1054_s2 + $0x18] sm:$0xff]  ;;  %s770_s12 = scalar_lea.hbm %s769_s24, 16 }
  0x18   : > { %v295_v0 = vld [vmem:[%s932_s15 + $0x78] sm:$0xff]  ;;  %v294_v1 = vld [vmem:[%s932_s15 + $0x70] sm:$0xff]  ;;  %v293_v2 = vld [vmem:[%s932_s15 + $0x68] sm:$0xff]  ;;  %481 = vperm.xlu2 %753, %v682_v38   ;;  %p771_p12 = scmp.ne.s32.totalorder %s769_s24, %s770_s12  ;;  %p775_p1 = scmp.lt.s32.totalorder %s769_s24, %s1058_s6 }
  0x19   : > { %656 = vmatpush.xpose.msk.msra.mxu0 %vm303_vm0, %v295_v0  ;;  %v292_v3 = vld [vmem:[%s932_s15 + $0x60] sm:$0xff]  ;;  %v291_v4 = vld [vmem:[%s932_s15 + $0x58] sm:$0xff]  ;;  %v290_v5 = vld [vmem:[%s932_s15 + $0x50] sm:$0xff] }
  0x1a   : > { %v289_v6 = vld [vmem:[%s932_s15 + $0x48] sm:$0xff]  ;;  %v288_v8 = vld [vmem:[%s932_s15 + $0x40] sm:$0xff]  ;;  %v287_v10 = vld [vmem:[%s932_s15 + $0x38] sm:$0xff]  ;;  %p772_p13 = pnand %p771_p12, %p912_p4 }
  0x1b   : > { %v286_v12 = vld [vmem:[%s932_s15 + $0x30] sm:$0xff]  ;;  %v285_v13 = vld [vmem:[%s932_s15 + $0x28] sm:$0xff]  ;;  %v284_v15 = vld [vmem:[%s932_s15 + $0x20] sm:$0xff] }
  0x1c   : > { %v283_v16 = vld [vmem:[%s932_s15 + $0x18] sm:$0xff]  ;;  %v282_v17 = vld [vmem:[%s932_s15 + $0x10] sm:$0xff]  ;;  %v281_v18 = vld [vmem:[%s932_s15 + $0x8] sm:$0xff]  ;;  %p773_p0 = pneg %p772_p13 }
  0x1d   : > { %657 = vmatpush.xpose.msk.msra.mxu0 %vm303_vm0, %v294_v1  ;;  %v280_v19 = vld [vmem:[%s932_s15] sm:$0xff]  ;;  %v509_v50 = vld [vmem:[%s1055_s3 + $0x8] sm:$0xff]  ;;  %s774_s15 = scalar_lea.hbm %s1058_s6, 32 }
  0x1e   : > { %381 = vperm.xlu0 %751, %v673_v11   ;;  %v510_v39 = vld [vmem:[%s1057_s5] sm:$0xff]  ;;  %p776_p2 = scmp.lt.s32.totalorder %s774_s15, %s770_s12 }
  0x1f   : > { %448 = vperm.xlu1 %752, %v679_v27   ;;  %v508_v49 = vld [vmem:[%s1055_s3] sm:$0xff] }
  0x20   : > { %514 = vperm.xlu2 %753, %v510_v39   ;;  %p777_p3 = por %p776_p2, %p775_p1 }
  0x21   : > { %658 = vmatpush.xpose.msk.msra.mxu0 %vm303_vm0, %v293_v2 }
  0x22   : > { %p778_p5 = pnand %p777_p3, %p773_p0 }
  0x25   : > { %659 = vmatpush.xpose.msk.msra.mxu0 %vm303_vm0, %v292_v3 }
  0x26   : > { %519 = vperm.xlu0 %751, %v511_v14  }
  0x29   : > { %660 = vmatpush.xpose.msk.msra.mxu0 %vm303_vm0, %v291_v4 }
  0x2d   : > { %661 = vmatpush.xpose.msk.msra.mxu0 %vm303_vm0, %v290_v5 }
  0x31   : > { %662 = vmatpush.xpose.msk.msra.mxu0 %vm303_vm0, %v289_v6 }
  0x35   : > { %663 = vmatpush.xpose.msk.msra.mxu0 %vm303_vm0, %v288_v8 }
  0x39   : > { %664 = vmatpush.xpose.msk.msra.mxu0 %vm303_vm0, %v287_v10 }
  0x3d   : > { %665 = vmatpush.xpose.msk.msra.mxu0 %vm303_vm0, %v286_v12 }
  0x41   : > { %666 = vmatpush.xpose.msk.msra.mxu0 %vm303_vm0, %v285_v13 }
  0x45   : > { %667 = vmatpush.xpose.msk.msra.mxu0 %vm303_vm0, %v284_v15 }
  0x49   : > { %668 = vmatpush.xpose.msk.msra.mxu0 %vm303_vm0, %v283_v16 }
  0x4d   : > { %669 = vmatpush.xpose.msk.msra.mxu0 %vm303_vm0, %v282_v17 }
  0x51   : > { %670 = vmatpush.xpose.msk.msra.mxu0 %vm303_vm0, %v281_v18 }
  0x55   : > { %671 = vmatpush.xpose.msk.msra.mxu0 %vm303_vm0, %v280_v19 }
  0x58   : > { %672 = vmatmul.msk.f32.vlgmr.msra.gmra.mxu0 %vm303_vm0, %v296_v20 }
  0x72   : > { %v482_v45 = vpop.permute.xlu2 %481 }
  0x7a   : > { %v515_v51 = vpop.permute.xlu2 %514 }
  0x88   : > { %v301_v21 = vpop.permute.xlu0 %300 }
  0x89   : > { %v416_v33 = vpop.permute.xlu1 %415 }
  0x90   : > { %v382_v28 = vpop.permute.xlu0 %381 }
  0x91   : > { %v449_v40 = vpop.permute.xlu1 %448 }
  0x98   : > { %v520_v54 = vpop.permute.xlu0 %519 }
  0xd5   : > { %v372_v22 = vpop.f32.mrf.mxu0 }
  0xd6   : > { %v373_v23 = vadd.f32 %v372_v22, %v301_v21 }
  0xd8   : > { %v375_v24 = vmax.f32 %v373_v23, 0.0 }
  0xda   : > { %403 = vmatpush.msra.mxu1 %v375_v24 }
  0xdb   : > { %674 = vmatmul.msk.f32.vlgmr.msra.gmra.mxu1 %vm384_vm1, %v376_v25 }
 0x158   : > { %v405_v29 = vpop.f32.mrf.mxu1 }
 0x159   : > { %v406_v30 = vadd.f32 %v405_v29, %v382_v28 }
 0x15b   : > { %v408_v31 = vmax.f32 %v406_v30, 0.0 }
 0x15d   : > { %436 = vmatpush.msra.mxu2 %v408_v31 }
 0x15e   : > { %677 = vmatmul.msk.f32.vlgmr.msra.gmra.mxu2 %vm384_vm1, %v675_v32 }
 0x1e1   : > { %v438_v34 = vpop.f32.mrf.mxu2 }
 0x1e2   : > { %v439_v35 = vadd.f32 %v438_v34, %v416_v33 }
 0x1e4   : > { %v441_v36 = vmax.f32 %v439_v35, 0.0 }
 0x1e6   : > { %469 = vmatpush.msra.mxu3 %v441_v36 }
 0x1e7   : > { %680 = vmatmul.msk.f32.vlgmr.msra.gmra.mxu3 %vm384_vm1, %v678_v37 }
 0x26a   : > { %v471_v41 = vpop.f32.mrf.mxu3 }
 0x26b   : > { %v472_v42 = vadd.f32 %v471_v41, %v449_v40 }
 0x26d   : > { %v474_v43 = vmax.f32 %v472_v42, 0.0 }
 0x26f   : > { %502 = vmatpush.msrb.mxu1 %v474_v43 }
 0x270   : > { %683 = vmatmul.msk.f32.vlgmr.msrb.gmra.mxu1 %vm384_vm1, %v681_v44 }
 0x2ed   : > { %v504_v46 = vpop.f32.mrf.mxu1 }
 0x2ee   : > { %v505_v47 = vadd.f32 %v504_v46, %v482_v45 }
 0x2f0   : > { %v507_v48 = vmax.f32 %v505_v47, 0.0 }
 0x2f2   : > { %543 = vmatpush.msrb.mxu2 %v507_v48 }
 0x2f3   : > { %684 = vmatmul.msk.f32.vlgmr.msrb.gmra.mxu2 %vm384_vm1, %v508_v49 }
 0x2fb   : > { %685 = vmatmul.msk.f32.gmra.mxu2 %vm384_vm1, %v509_v50 }
 0x376   : > { %v545_v52 = vpop.f32.mrf.mxu2 }
 0x377   : > { %v546_v53 = vadd.f32 %v545_v52, %v515_v51 }
 0x379   : > { %551 = vst [vmem:[%s269_s28] sm:$0xff] %v546_v53 }
 0x37e   : > { %v548_v55 = vpop.f32.mrf.mxu2 }
 0x37f   : > { %v549_v56 = vadd.f32 %v548_v55, %v520_v54 }
 0x381   : > { %552 = vst [vmem:[%s269_s28 + $0x8] sm:$0xff] %v549_v56 }
 0x382   : > { %781 = shalt.err (!%p778_p5)
}
 0x383   : > { %s835_s16 = smov 128   ;;  %s836_s19 = smov 8  }
 0x384   : > { %693 = dma.vmem_to_hbm [thread:$0]  (%p912_p4), %s568_s30, 256, %s570_s8, %s554_s11, %s835_s16, %s835_s16, %s836_s19  }
 0x385 PF: > { %p699_p6 = scmp.ge.s32.totalorder %s832_s26, 2  ;;  %s584_s20 = sand.u32 1, %s812_s21  }
 0x386   : > { %s585_s27 = scalar_lea.sflag [#allocation3], %s584_s20 }
 0x387   : > { %p696_p7 = pnand %p699_p6, %p919_p8 }
 0x389   : > { %p697_p9 = pneg %p696_p7 }
 0x38b   : > { %807 = dma.done.wait (%p697_p9), %s585_s27, 256  }
 0x38c   : > { %809 = vsyncadd (%p697_p9), %s585_s27, 4294967040  ;;  %s19_s26 = sadd.s32 1, %s832_s26   ;;  %s1061_s21 = smov %s816_s22 }
 0x38d   : > { %p16_p10 = scmp.ge.s32.totalorder %s19_s26, 4   ;;  %s1062_s22 = smov %s820_s23 }
 0x38e   : > { %s1063_s23 = smov %s925_s10  ;;  %s1064_s24 = smov %s828_s25 }
 0x38f   : > { %s1065_s25 = smov %s1067_s29  ;;  %18 = sbr.rel (!%p16_p10) target bundleno = 4 (0x4), region = 86 }
 0x394   :  { %591 = vsyncpa [#allocation3], 1 }
 0x395   :  { %593 = vsyncpa [#allocation3 + $0x1], 1 }

</bundles_post_ra>
